<compile_context>
chip_gen: v7x
topology: tpu7x:2x2x1
jax: 0.10.0
libtpu: 0.0.40
codegen_flags: <defaults>
</compile_context>

<pallas_src>
import functools

import jax
import jax.numpy as jnp
from jax.experimental import pallas as pl
from jax.experimental.pallas import tpu as pltpu


# ----------------------------------------------------------------------------
# Kernel
# ----------------------------------------------------------------------------
def vi_kernel(x_ref, w1_ref, b1_ref, w2_ref, b2_ref, eps_ref, out_ref,
              *, n_output):
    x = x_ref[...]

    # Fused first layer: one MXU push -> [h_mu | h_lv]   (TILE_B, 2H)
    h = jnp.dot(x, w1_ref[...], preferred_element_type=jnp.float32) + b1_ref[...]
    h = jnp.maximum(h, 0.0)

    # Fused (block-diagonal) second layer: one MXU push -> [mu | log_var]
    o2 = jnp.dot(h, w2_ref[...], preferred_element_type=jnp.float32) + b2_ref[...]
    o2 = jnp.maximum(o2, 0.0)

    mu = o2[:, :n_output]
    lv = o2[:, n_output:]

    # Reparameterization: exp goes to the EUP slot (essentially free).
    sigma = jnp.exp(0.5 * lv) + 1e-05
    z = mu + sigma * eps_ref[...]

    # Single lane-packed output slab: [z | mu | log_var]
    out_ref[...] = jnp.concatenate([z, mu, lv], axis=1)


# ----------------------------------------------------------------------------
# Wrapper
# ----------------------------------------------------------------------------
def _round_up(n, m):
    return ((n + m - 1) // m) * m


def vi_forward(x, packed, eps, *, tile_b=256):
    """x: (B, n_input) f32; eps: (B, n_output) f32; packed: fused weight dict.

    Returns (z, mu, log_var), each (B, n_output) f32.
    """
    B, n_input = x.shape
    n_output = eps.shape[1]
    h2 = packed["w1"].shape[1]                     # fused hidden width = 2*H

    # Batch tiling: multiple of 8 sublanes, pad B up to a full tile multiple.
    tb = min(tile_b, _round_up(B, 8))
    Bp = _round_up(B, tb)
    if Bp != B:
        pad = Bp - B
        x = jnp.pad(x, ((0, pad), (0, 0)))
        eps = jnp.pad(eps, ((0, pad), (0, 0)))

    grid = (Bp // tb,)

    kernel = functools.partial(vi_kernel, n_output=n_output)

    out = pl.pallas_call(
        kernel,
        out_shape=jax.ShapeDtypeStruct((Bp, 3 * n_output), jnp.float32),
        grid_spec=pltpu.PrefetchScalarGridSpec(
            num_scalar_prefetch=0,
            grid=grid,
            in_specs=[
                # Batch-tiled streams (double-buffered DMA over the grid).
                pl.BlockSpec((tb, n_input), lambda i: (i, 0)),          # x
                # Packed weights / biases: same block every step -> resident.
                pl.BlockSpec((n_input, h2), lambda i: (0, 0)),          # W1
                pl.BlockSpec((1, h2), lambda i: (0, 0)),                # b1
                pl.BlockSpec((h2, 2 * n_output), lambda i: (0, 0)),     # W2
                pl.BlockSpec((1, 2 * n_output), lambda i: (0, 0)),      # b2
                pl.BlockSpec((tb, n_output), lambda i: (i, 0)),         # eps
            ],
            out_specs=pl.BlockSpec((tb, 3 * n_output), lambda i: (i, 0)),
        ),
        compiler_params=pltpu.CompilerParams(
            dimension_semantics=("parallel",),
        ),
    )(x, packed["w1"], packed["b1"], packed["w2"], packed["b2"], eps)

    z = out[:B, :n_output]
    mu = out[:B, n_output:2 * n_output]
    lv = out[:B, 2 * n_output:]
    return z, mu, lv


# ----------------------------------------------------------------------------
# Parameter init (mimics nn.Linear's uniform(-1/sqrt(fan_in), +) scheme) and
# packing into the fused layout the kernel consumes.
# ----------------------------------------------------------------------------
def init_params(key, n_input, n_hidden, n_output):
    def linear(key, fan_in, fan_out):
        kw, kb = jax.random.split(key)
        bound = 1.0 / jnp.sqrt(fan_in)
        w = jax.random.uniform(kw, (fan_in, fan_out), jnp.float32, -bound, bound)
        b = jax.random.uniform(kb, (1, fan_out), jnp.float32, -bound, bound)
        return w, b

    h = n_hidden * 2
    k1, k2, k3, k4 = jax.random.split(key, 4)
    w1m, b1m = linear(k1, n_input, h)
    w2m, b2m = linear(k2, h, n_output)
    w1v, b1v = linear(k3, n_input, h)
    w2v, b2v = linear(k4, h, n_output)
    return {
        "w1_mu": w1m, "b1_mu": b1m, "w2_mu": w2m, "b2_mu": b2m,
        "w1_lv": w1v, "b1_lv": b1v, "w2_lv": w2v, "b2_lv": b2v,
    }


def pack_params(p):
    """Fuse the two branches: concat layer-1, block-diagonal layer-2."""
    H = p["w1_mu"].shape[1]
    n_out = p["w2_mu"].shape[1]
    w1 = jnp.concatenate([p["w1_mu"], p["w1_lv"]], axis=1)          # (n_in, 2H)
    b1 = jnp.concatenate([p["b1_mu"], p["b1_lv"]], axis=1)          # (1, 2H)
    w2 = jnp.zeros((2 * H, 2 * n_out), jnp.float32)
    w2 = w2.at[:H, :n_out].set(p["w2_mu"]).at[H:, n_out:].set(p["w2_lv"])
    b2 = jnp.concatenate([p["b2_mu"], p["b2_lv"]], axis=1)          # (1, 2*n_out)
    return {"w1": w1, "b1": b1, "w2": w2, "b2": b2}


# ----------------------------------------------------------------------------
# Demo / correctness check
# ----------------------------------------------------------------------------
if __name__ == "__main__":
    n_input, n_hidden, n_output = 4, 16, 4
    batch = 64          # small demo batch; tile_b=32 -> grid of 2 steps

    key = jax.random.PRNGKey(0)
    k_params, k_x, k_eps = jax.random.split(key, 3)

    params = init_params(k_params, n_input, n_hidden, n_output)
    packed = pack_params(params)
    x = jax.random.normal(k_x, (batch, n_input), jnp.float32)
    eps = jax.random.normal(k_eps, (batch, n_output), jnp.float32)

    z, mu, log_var = vi_forward(x, packed, eps, tile_b=32)
    jax.block_until_ready((z, mu, log_var))

    # Pure-JAX reference using the ORIGINAL (unfused) weights.
    def ref(x, p, eps):
        h = jnp.maximum(x @ p["w1_mu"] + p["b1_mu"], 0.0)
        mu = jnp.maximum(h @ p["w2_mu"] + p["b2_mu"], 0.0)
        h = jnp.maximum(x @ p["w1_lv"] + p["b1_lv"], 0.0)
        lv = jnp.maximum(h @ p["w2_lv"] + p["b2_lv"], 0.0)
        sigma = jnp.exp(0.5 * lv) + 1e-05
        return mu + sigma * eps, mu, lv

    z_r, mu_r, lv_r = ref(x, params, eps)
    assert jnp.allclose(z, z_r, atol=1e-4), "z mismatch"
    assert jnp.allclose(mu, mu_r, atol=1e-4), "mu mismatch"
    assert jnp.allclose(log_var, lv_r, atol=1e-4), "log_var mismatch"

    print("KERNEL_OK")
</pallas_src>

<mosaic_0001>
module attributes {stable_mosaic.version = 11 : i64} {
  func.func @vi_kernel(%arg0: i32, %arg1: memref<32x4xf32, #tpu.memory_space<vmem>>, %arg2: memref<4x64xf32, #tpu.memory_space<vmem>>, %arg3: memref<1x64xf32, #tpu.memory_space<vmem>>, %arg4: memref<64x8xf32, #tpu.memory_space<vmem>>, %arg5: memref<1x8xf32, #tpu.memory_space<vmem>>, %arg6: memref<32x4xf32, #tpu.memory_space<vmem>>, %arg7: memref<32x12xf32, #tpu.memory_space<vmem>>) attributes {dimension_semantics = [#tpu.dimension_semantics<parallel>], iteration_bounds = array<i64: 2>, scalar_prefetch = 0 : i64, scratch_operands = 0 : i64, tpu.core_type = #tpu.core_type<tc>, window_params = [{transform_indices = @transform_0, window_bounds = array<i64: 32, 4>}, {pipeline_mode = #tpu.pipeline_mode<synchronous>, transform_indices = @transform_1, window_bounds = array<i64: 4, 64>}, {pipeline_mode = #tpu.pipeline_mode<synchronous>, transform_indices = @transform_2, window_bounds = array<i64: 1, 64>}, {pipeline_mode = #tpu.pipeline_mode<synchronous>, transform_indices = @transform_3, window_bounds = array<i64: 64, 8>}, {pipeline_mode = #tpu.pipeline_mode<synchronous>, transform_indices = @transform_4, window_bounds = array<i64: 1, 8>}, {transform_indices = @transform_5, window_bounds = array<i64: 32, 4>}, {transform_indices = @transform_6, window_bounds = array<i64: 32, 12>}]} {
    %c0 = arith.constant 0 : index
    %c0_0 = arith.constant 0 : index
    %0 = vector.load %arg1[%c0, %c0_0] : memref<32x4xf32, #tpu.memory_space<vmem>>, vector<32x4xf32>
    %c0_1 = arith.constant 0 : index
    %c0_2 = arith.constant 0 : index
    %1 = vector.load %arg2[%c0_1, %c0_2] : memref<4x64xf32, #tpu.memory_space<vmem>>, vector<4x64xf32>
    %cst = arith.constant dense<0.000000e+00> : vector<32x64xf32>
    %2 = tpu.matmul %0, %1, %cst {dimension_numbers = #tpu.dot_dimension_numbers<[1], [0], [0], [1], [0, 0, 1, 1], [], []>} : vector<32x4xf32>, vector<4x64xf32>, vector<32x64xf32> -> vector<32x64xf32>
    %c0_3 = arith.constant 0 : index
    %c0_4 = arith.constant 0 : index
    %3 = vector.load %arg3[%c0_3, %c0_4] : memref<1x64xf32, #tpu.memory_space<vmem>>, vector<1x64xf32>
    %4 = vector.broadcast %3 : vector<1x64xf32> to vector<32x64xf32>
    %5 = arith.addf %2, %4 : vector<32x64xf32>
    %cst_5 = arith.constant 0.000000e+00 : f32
    %6 = vector.broadcast %cst_5 : f32 to vector<32x64xf32>
    %7 = arith.maximumf %5, %6 : vector<32x64xf32>
    %c0_6 = arith.constant 0 : index
    %c0_7 = arith.constant 0 : index
    %8 = vector.load %arg4[%c0_6, %c0_7] : memref<64x8xf32, #tpu.memory_space<vmem>>, vector<64x8xf32>
    %cst_8 = arith.constant dense<0.000000e+00> : vector<32x8xf32>
    %9 = tpu.matmul %7, %8, %cst_8 {dimension_numbers = #tpu.dot_dimension_numbers<[1], [0], [0], [1], [0, 0, 1, 1], [], []>} : vector<32x64xf32>, vector<64x8xf32>, vector<32x8xf32> -> vector<32x8xf32>
    %c0_9 = arith.constant 0 : index
    %c0_10 = arith.constant 0 : index
    %10 = vector.load %arg5[%c0_9, %c0_10] : memref<1x8xf32, #tpu.memory_space<vmem>>, vector<1x8xf32>
    %11 = vector.broadcast %10 : vector<1x8xf32> to vector<32x8xf32>
    %12 = arith.addf %9, %11 : vector<32x8xf32>
    %cst_11 = arith.constant 0.000000e+00 : f32
    %13 = vector.broadcast %cst_11 : f32 to vector<32x8xf32>
    %14 = arith.maximumf %12, %13 : vector<32x8xf32>
    %15 = vector.extract_strided_slice %14 {offsets = [0, 0], sizes = [32, 4], strides = [1, 1]} : vector<32x8xf32> to vector<32x4xf32>
    %16 = vector.extract_strided_slice %14 {offsets = [0, 4], sizes = [32, 4], strides = [1, 1]} : vector<32x8xf32> to vector<32x4xf32>
    %cst_12 = arith.constant 5.000000e-01 : f32
    %17 = vector.broadcast %cst_12 : f32 to vector<32x4xf32>
    %18 = arith.mulf %17, %16 : vector<32x4xf32>
    %19 = math.exp %18 : vector<32x4xf32>
    %cst_13 = arith.constant 9.99999974E-6 : f32
    %20 = vector.broadcast %cst_13 : f32 to vector<32x4xf32>
    %21 = arith.addf %19, %20 : vector<32x4xf32>
    %c0_14 = arith.constant 0 : index
    %c0_15 = arith.constant 0 : index
    %22 = vector.load %arg6[%c0_14, %c0_15] : memref<32x4xf32, #tpu.memory_space<vmem>>, vector<32x4xf32>
    %23 = arith.mulf %21, %22 : vector<32x4xf32>
    %24 = arith.addf %15, %23 : vector<32x4xf32>
    %25 = tpu.concatenate %24, %15, %16 in 1 : vector<32x4xf32>, vector<32x4xf32>, vector<32x4xf32> -> vector<32x12xf32>
    %c0_16 = arith.constant 0 : index
    %c0_17 = arith.constant 0 : index
    %26 = vector.load %arg7[%c0_16, %c0_17] : memref<32x12xf32, #tpu.memory_space<vmem>>, vector<32x12xf32>
    tpu.vector_store %arg7[%c0_16, %c0_17], %25 {strides = array<i32>} : memref<32x12xf32, #tpu.memory_space<vmem>>, vector<32x12xf32>,
    return
  }
  func.func @transform_0(%arg0: i32) -> (i32, i32) {
    %c0_i32 = arith.constant 0 : i32
    %c0_i32_0 = arith.constant 0 : i32
    return %arg0, %c0_i32 : i32, i32
  }
  func.func @transform_1(%arg0: i32) -> (i32, i32) {
    %c0_i32 = arith.constant 0 : i32
    %c0_i32_0 = arith.constant 0 : i32
    %c0_i32_1 = arith.constant 0 : i32
    return %c0_i32, %c0_i32_0 : i32, i32
  }
  func.func @transform_2(%arg0: i32) -> (i32, i32) {
    %c0_i32 = arith.constant 0 : i32
    %c0_i32_0 = arith.constant 0 : i32
    %c0_i32_1 = arith.constant 0 : i32
    return %c0_i32, %c0_i32_0 : i32, i32
  }
  func.func @transform_3(%arg0: i32) -> (i32, i32) {
    %c0_i32 = arith.constant 0 : i32
    %c0_i32_0 = arith.constant 0 : i32
    %c0_i32_1 = arith.constant 0 : i32
    return %c0_i32, %c0_i32_0 : i32, i32
  }
  func.func @transform_4(%arg0: i32) -> (i32, i32) {
    %c0_i32 = arith.constant 0 : i32
    %c0_i32_0 = arith.constant 0 : i32
    %c0_i32_1 = arith.constant 0 : i32
    return %c0_i32, %c0_i32_0 : i32, i32
  }
  func.func @transform_5(%arg0: i32) -> (i32, i32) {
    %c0_i32 = arith.constant 0 : i32
    %c0_i32_0 = arith.constant 0 : i32
    return %arg0, %c0_i32 : i32, i32
  }
  func.func @transform_6(%arg0: i32) -> (i32, i32) {
    %c0_i32 = arith.constant 0 : i32
    %c0_i32_0 = arith.constant 0 : i32
    return %arg0, %c0_i32 : i32, i32
  }
}

</mosaic_0001>

<bundles_post_ra>
// kernel: tpu_custom_call.1
= control target key start
LH: loop header
LB: loop body
LE: loop exit
PB: predicated region body
PF: predicated region fallthrough
CT: control target
= control target key end

     0   :  { %s828_s21 = smov 0   ;;  %s910_s0 = inlined_call_operand.vmem [shape: f32[64,4], index: 0, kind: input, shape index: {}]   ;;  %s911_s1 = inlined_call_operand.vmem [shape: f32[4,64], index: 1, kind: input, shape index: {}]   ;;  %s912_s2 = inlined_call_operand.vmem [shape: f32[1,64], index: 2, kind: input, shape index: {}]   ;;  %s913_s3 = inlined_call_operand.vmem [shape: f32[64,8], index: 3, kind: input, shape index: {}]   ;;  %s914_s4 = inlined_call_operand.vmem [shape: f32[1,8], index: 4, kind: input, shape index: {}]   ;;  %s915_s5 = inlined_call_operand.vmem [shape: f32[64,4], index: 5, kind: input, shape index: {}]   ;;  %s916_s6 = inlined_call_operand.vmem [shape: f32[64,12], index: 6, kind: output, shape index: {}]  }
   0x1 LB: > { %s670_s22 = sadd.s32 4294967295, %s789_s21   ;;  %p674_p0 = scmp.ge.s32.totalorder %s789_s21, 1  ;;  %s789_s21 = sphi %s828_s21, %s16_s21  }
   0x2   : > { %p224_p1 = scmp.lt.s32.totalorder %s789_s21, 3 }
   0x4   : > { %p225_p2 = pnand %p674_p0, %p224_p1 }
   0x5   : > { %v281_v0 = vld [vmem:[%s911_s1] sm:$0xf] (!%p225_p2)  ;;  %vm302_vm0 = vcmask (!%p225_p2), 1043456   ;;  %s675_s25 = sshll.u32 (!%p225_p2), %s670_s22, 2  ;;  %v396_v2 = vld [vmem:[%s913_s3 + $0x8] sm:$0xff] (!%p225_p2)  ;;  %v397_v3 = vld [vmem:[%s913_s3 + $0x10] sm:$0xff] (!%p225_p2) }
   0x6   : > { %228 = sbr.rel (%p225_p2) target bundleno = 602 (0x25a), region = 44  ;;  %v395_v1 = vld [vmem:[%s913_s3] sm:$0xff] (!%p225_p2)  ;;  %711 = vmatprep.subr.msk.mxu0 (!%p225_p2), %vm302_vm0, %v281_v0  ;;  %p260_p3 = scmp.lt.s32.totalorder (!%p225_p2), %s675_s25, 7  ;;  %v398_v4 = vld [vmem:[%s913_s3 + $0x18] sm:$0xff] (!%p225_p2)  ;;  %vm289_vm1 = vcmask (!%p225_p2), 31744   ;;  %v400_v8 = vld [vmem:[%s913_s3 + $0x28] sm:$0xff] (!%p225_p2) }
   0x7   : > { %712 = vmatpush3.msk.msra.mxu0 (!%p225_p2), %vm302_vm0, %v281_v0  ;;  %v741_v5 = vpack.c.bf16 (!%p225_p2), %v396_v2, %v395_v1  ;;  %v745_v6 = vpack.c.bf16 (!%p225_p2), %v398_v4, %v397_v3  ;;  %v399_v7 = vld [vmem:[%s913_s3 + $0x20] sm:$0xff] (!%p225_p2)  ;;  %v401_v14 = vld [vmem:[%s913_s3 + $0x30] sm:$0xff] (!%p225_p2)  ;;  %v402_v15 = vld [vmem:[%s913_s3 + $0x38] sm:$0xff] (!%p225_p2)  ;;  %s791_s26 = smov (!%p225_p2), 4   ;;  %vm410_vm2 = vcmask (!%p225_p2), 523264   ;;  %s792_s7 = smov (!%p225_p2), 124  }
   0x8   : > { %v749_v12 = vpack.c.bf16 (!%p225_p2), %v400_v8, %v399_v7  ;;  %v753_v16 = vpack.c.bf16 (!%p225_p2), %v402_v15, %v401_v14  ;;  %v681_v21 = vld [vmem:[%s912_s2] ss:$0 sm:$0xff] (!%p225_p2)  ;;  %vm592_vm3 = vcmask (!%p225_p2), 64512   ;;  %vm597_vm4 = vcmask (!%p225_p2), 97280  }
   0x9   : > { %742 = vmatprep.subr.bf16.mxu0 (!%p225_p2), %v741_v5  ;;  %757 = vmatprep.subr.bf16.mxu1 (!%p225_p2), %v741_v5  ;;  %v687_v34 = vld [vmem:[%s914_s4] ss:$0 sm:$0xff] (!%p225_p2) }
   0xa   : > { %761 = vmatpush3.bf16.msra.mxu1 (!%p225_p2), %v741_v5 }
   0xb   : > { %758 = vmatprep.subr.bf16.mxu1 (!%p225_p2), %v745_v6 }
   0xd   : > { %s918_s25 = smov (!%p260_p3, %s675_s25), 7 }
   0xe   : > { %s851_s10 = sshll.u32 %s918_s25, 3  ;;  %762 = vmatpush3.bf16.msra.mxu1 %v745_v6 }
   0xf   : > { %s263_s13 = scalar_lea.vmem %s910_s0, %s851_s10  ;;  %759 = vmatprep.subr.bf16.mxu1 %v749_v12  ;;  %s269_s25 = scalar_lea.vmem %s915_s5, %s851_s10 }
  0x10   : > { %v277_v9 = vld [vmem:[%s263_s13] sm:$0xff]  ;;  %v278_v10 = vld [vmem:[%s263_s13 + $0x8] sm:$0xff]  ;;  %v279_v11 = vld [vmem:[%s263_s13 + $0x10] sm:$0xff]  ;;  %s275_s11 = scalar_lea.vmem %s916_s6, %s851_s10 }
  0x11   : > { %713 = vmatprep.mubr.msk.f32.mxu0 %vm289_vm1, %v277_v9  ;;  %v280_v13 = vld [vmem:[%s263_s13 + $0x18] sm:$0xff]  ;;  %v528_v17 = vld [vmem:[%s269_s25] sm:$0xff]  ;;  %v530_v18 = vld [vmem:[%s269_s25 + $0x10] sm:$0xff] }
  0x12   : > { %714 = vmatmul.mubr.msk.f32.vlgmr.msra.gmra.mrb[0].mxu0 %vm289_vm1, %v278_v10  ;;  %763 = vmatpush3.bf16.msra.mxu1 %v749_v12  ;;  %v529_v19 = vld [vmem:[%s269_s25 + $0x8] sm:$0xff]  ;;  %v531_v20 = vld [vmem:[%s269_s25 + $0x18] sm:$0xff] }
  0x13   : > { %716 = vmatprep.mubr.msk.f32.mxu0 %vm289_vm1, %v279_v11  ;;  %744 = vmatpush3.bf16.msra.mxu0 %v741_v5 }
  0x14   : > { %746 = vmatprep.subr.bf16.mxu0 %v745_v6  ;;  %760 = vmatprep.subr.bf16.mxu1 %v753_v16 }
  0x15   : > { %536 = vrot.lane.b32.xlu0 %v528_v17, %s791_s26  ;;  %540 = vrot.lane.b32.xlu1 %v530_v18, %s791_s26 }
  0x16   : > { %717 = vmatmul.mubr.msk.f32.gmra.mrb[2].mxu0 %vm289_vm1, %v280_v13  ;;  %764 = vmatpush3.bf16.msra.mxu1 %v753_v16 }
  0x17   : > { %748 = vmatpush3.bf16.msra.mxu0 %v745_v6 }
  0x18   : > { %750 = vmatprep.subr.bf16.mxu0 %v749_v12 }
  0x19   : > { %538 = vrot.lane.b32.xlu0 %v529_v19, %s791_s26  ;;  %542 = vrot.lane.b32.xlu1 %v531_v20, %s791_s26 }
  0x1b   : > { %752 = vmatpush3.bf16.msra.mxu0 %v749_v12 }
  0x1c   : > { %754 = vmatprep.subr.bf16.mxu0 %v753_v16 }
  0x1f   : > { %756 = vmatpush3.bf16.msra.mxu0 %v753_v16 }
  0x87   : > { %v537_v55 = vpop.permute.xlu0 %536  ;;  %v541_v56 = vpop.permute.xlu1 %540 }
  0x8b   : > { %v539_v58 = vpop.permute.xlu0 %538  ;;  %v543_v1 = vpop.permute.xlu1 %542 }
  0xe5   : > { %v715_v22 = vpop.f32.mrb[0].mxu0 }
  0xe6   : > { %v378_v23 = vadd.f32 %v715_v22, %v681_v21  ;;  %v372_v24 = vpop.f32.mrb[1].mxu0 }
  0xe7   : > { %v373_v25 = vadd.f32 %v681_v21, %v372_v24 }
  0xe8   : > { %v392_v28 = vmax.f32 %v378_v23, 0.0 }
  0xe9   : > { %v391_v26 = vmax.f32 %v373_v25, 0.0  ;;  %v718_v27 = vpop.f32.mrb[2].mxu0 }
  0xea   : > { %v388_v29 = vadd.f32 %v718_v27, %v681_v21  ;;  %v382_v30 = vpop.f32.mrb[3].mxu0 }
  0xeb   : > { %v383_v31 = vadd.f32 %v681_v21, %v382_v30  ;;  %735 = vmatprep.mubr.msk.f32.mxu0 %vm410_vm2, %v391_v26 }
  0xec   : > { %v394_v32 = vmax.f32 %v388_v29, 0.0  ;;  %736 = vmatmul.mubr.msk.f32.vlgmr.msra.gmra.mrb[4].mxu0 %vm410_vm2, %v392_v28 }
  0xed   : > { %v393_v33 = vmax.f32 %v383_v31, 0.0 }
  0xef   : > { %738 = vmatprep.mubr.msk.f32.mxu1 %vm410_vm2, %v393_v33 }
  0xf0   : > { %739 = vmatmul.mubr.msk.f32.vlgmr.msra.gmra.mrb[0].mxu1 %vm410_vm2, %v394_v32 }
 0x1bf   : > { %v737_v35 = vpop.f32.mrb[4].mxu0 }
 0x1c0   : > { %v495_v36 = vadd.f32 %v737_v35, %v687_v34  ;;  %v489_v37 = vpop.f32.mrb[5].mxu0 }
 0x1c1   : > { %v490_v38 = vadd.f32 %v687_v34, %v489_v37 }
 0x1c2   : > { %v509_v39 = vmax.f32 %v495_v36, 0.0 }
 0x1c3   : > { %v508_v40 = vmax.f32 %v490_v38, 0.0  ;;  %v740_v41 = vpop.f32.mrb[0].mxu1 }
 0x1c4   : > { %v513_v42 = vmul.f32 0.5, %v509_v39  ;;  %v505_v43 = vadd.f32 %v740_v41, %v687_v34  ;;  %v499_v44 = vpop.f32.mrb[1].mxu1  ;;  %578 = vrot.lane.b32.xlu1 %v509_v39, %s791_s26 }
 0x1c5   : > { %v512_v45 = vmul.f32 0.5, %v508_v40  ;;  %v500_v46 = vadd.f32 %v687_v34, %v499_v44 }
 0x1c6   : > { %v511_v47 = vmax.f32 %v505_v43, 0.0  ;;  %v518_v48 = vmul.f32 1.442695, %v513_v42 }
 0x1c7   : > { %v510_v49 = vmax.f32 %v500_v46, 0.0  ;;  %v516_v50 = vmul.f32 1.442695, %v512_v45 }
 0x1c8   : > { %v515_v51 = vmul.f32 0.5, %v511_v47  ;;  %576 = vrot.lane.b32.xlu1 %v508_v40, %s791_s26  ;;  %775 = vpow2.f32 %v518_v48 }
 0x1c9   : > { %v514_v52 = vmul.f32 0.5, %v510_v49  ;;  %777 = vpow2.f32 %v516_v50 }
 0x1ca   : > { %v522_v53 = vmul.f32 1.442695, %v515_v51 }
 0x1cb   : > { %v520_v54 = vmul.f32 1.442695, %v514_v52 }
 0x1cc   : > { %779 = vpow2.f32 %v522_v53 }
 0x1cd   : > { %781 = vpow2.f32 %v520_v54 }
 0x1d2   : > { %v776_v57 = vpop.eup %775 }
 0x1d3   : > { %v778_v59 = vpop.eup %777  ;;  %v525_v60 = vadd.f32 1e-05, %v776_v57 }
 0x1d4   : > { %v524_v61 = vadd.f32 1e-05, %v778_v59 }
 0x1d5   : > { %v549_v62 = vmul.f32 %v539_v58, %v525_v60 }
 0x1d6   : > { %v780_v63 = vpop.eup %779  ;;  %v548_v0 = vmul.f32 %v537_v55, %v524_v61 }
 0x1d7   : > { %v782_v2 = vpop.eup %781  ;;  %558 = vrot.lane.b32.xlu1 %v549_v62, %s792_s7  ;;  %v527_v3 = vadd.f32 1e-05, %v780_v63 }
 0x1d8   : > { %556 = vrot.lane.b32.xlu0 %v548_v0, %s792_s7  ;;  %v526_v5 = vadd.f32 1e-05, %v782_v2 }
 0x1d9   : > { %v551_v4 = vmul.f32 %v543_v1, %v527_v3 }
 0x1da   : > { %v550_v6 = vmul.f32 %v541_v56, %v526_v5 }
 0x1db   : > { %582 = vrot.lane.b32.xlu1 %v511_v47, %s791_s26 }
 0x1dc   : > { %562 = vrot.lane.b32.xlu0 %v551_v4, %s792_s7 }
 0x1e0   : > { %560 = vrot.lane.b32.xlu0 %v550_v6, %s792_s7 }
 0x1e4   : > { %580 = vrot.lane.b32.xlu0 %v510_v49, %s791_s26 }
 0x236   : > { %v579_v7 = vpop.permute.xlu1 %578 }
 0x23a   : > { %v577_v8 = vpop.permute.xlu1 %576 }
 0x249   : > { %v559_v9 = vpop.permute.xlu1 %558 }
 0x24a   : > { %v569_v10 = vadd.f32 %v559_v9, %v509_v39  ;;  %v557_v11 = vpop.permute.xlu0 %556 }
 0x24b   : > { %v568_v12 = vadd.f32 %v557_v11, %v508_v40 }
 0x24c   : > { %v589_v13 = vsel %vm289_vm1, %v569_v10, %v579_v7 }
 0x24d   : > { %v588_v14 = vsel %vm289_vm1, %v568_v12, %v577_v8  ;;  %v594_v17 = vsel %vm592_vm3, %v589_v13, %v579_v7  ;;  %v583_v20 = vpop.permute.xlu1 %582 }
 0x24e   : > { %v563_v15 = vpop.permute.xlu0 %562  ;;  %v593_v16 = vsel %vm592_vm3, %v588_v14, %v577_v8  ;;  %599 = vst.msk [vmem:[%s275_s11 + $0x8] sm:$0xff] %vm597_vm4, %v594_v17 }
 0x24f   : > { %598 = vst.msk [vmem:[%s275_s11] sm:$0xff] %vm597_vm4, %v593_v16  ;;  %v571_v18 = vadd.f32 %v563_v15, %v511_v47 }
 0x251   : > { %v591_v22 = vsel %vm289_vm1, %v571_v18, %v583_v20 }
 0x252   : > { %v561_v19 = vpop.permute.xlu0 %560  ;;  %v596_v26 = vsel %vm592_vm3, %v591_v22, %v583_v20 }
 0x253   : > { %v570_v21 = vadd.f32 %v561_v19, %v510_v49  ;;  %601 = vst.msk [vmem:[%s275_s11 + $0x18] sm:$0xff] %vm597_vm4, %v596_v26 }
 0x256   : > { %v581_v23 = vpop.permute.xlu0 %580 }
 0x257   : > { %v590_v24 = vsel %vm289_vm1, %v570_v21, %v581_v23 }
 0x258   : > { %v595_v25 = vsel %vm592_vm3, %v590_v24, %v581_v23 }
 0x259   : > { %600 = vst.msk [vmem:[%s275_s11 + $0x10] sm:$0xff] %vm597_vm4, %v595_v25 }
 0x25a PF: > { %s16_s21 = sadd.s32 1, %s789_s21  }
 0x25b   : > { %p13_p4 = scmp.ge.s32.totalorder %s16_s21, 4  }
 0x25d   :  { %15 = sbr.rel (!%p13_p4) target bundleno = 1 (0x1), region = 77 }

</bundles_post_ra>
